<compile_context>
chip_gen: v7x
topology: tpu7x:2x2x1
jax: 0.10.0
libtpu: 0.0.40
codegen_flags: <defaults>
</compile_context>

<pallas_src>
import functools

import jax
import jax.numpy as jnp
from jax.experimental import pallas as pl
from jax.experimental.pallas import tpu as pltpu

MAX_PIXEL_TILE = 2048  # lane-dim pixel tile cap; double-buffered blocks stay well under the
                       # default scoped-VMEM limit even on v7x (64 MiB physical).


def _pick_pixel_tile(hw):
    """Largest multiple of 128 that divides hw, capped at MAX_PIXEL_TILE."""
    best = 0
    t = 128
    while t <= min(hw, MAX_PIXEL_TILE):
        if hw % t == 0:
            best = t
        t += 128
    if best == 0:
        raise ValueError(f"H*W={hw} must be a multiple of 128")
    return best


def fused_seg_kernel(x_ref, lbl_ref, w1_ref, b1_ref, w2_ref, b2_ref, o_ref, *, num_classes):
    """Fused encoder + decoder + NLL/pixel-acc partial reduction for one pixel tile.

    Layout: channels/classes on sublanes, pixels on lanes (lane-dense).
      x_ref  : (1, Cin, T)  f32   slice of the NCHW input viewed as (N, Cin, H*W)
      lbl_ref: (1, 1, T)    int32 labels, -1 == ignore_index
      w1_ref : (Cenc, Cin)  f32   encoder 1x1-conv weight (transposed)
      b1_ref : (Cenc, 1)    f32
      w2_ref : (K, Cenc)    f32   decoder 1x1-conv weight (transposed)
      b2_ref : (K, 1)       f32
      o_ref  : (8, 128)     f32   per-tile partials: [0,0]=sum nll, [1,0]=sum correct,
                                  [2,0]=sum valid, zeros elsewhere
    """
    x = x_ref[0]        # (Cin, T)
    lbl = lbl_ref[0]    # (1, T)

    # encoder: pointwise conv + ReLU  (channels on sublanes, pixels on lanes)
    feat = jnp.dot(w1_ref[...], x, preferred_element_type=jnp.float32)       # (Cenc, T)
    feat = jnp.maximum(feat + b1_ref[...], 0.0)

    # decoder: pointwise conv to classes + log_softmax over the class (sublane) axis
    logits = jnp.dot(w2_ref[...], feat, preferred_element_type=jnp.float32)  # (K, T)
    logits = logits + b2_ref[...]
    m = jnp.max(logits, axis=0, keepdims=True)                               # (1, T)
    z = logits - m
    lse = jnp.log(jnp.sum(jnp.exp(z), axis=0, keepdims=True))                # exp/log on EUP
    logp = z - lse                                                           # (K, T) log-probs

    # NLL (ignore_index=-1) + pixel accuracy, lane-dense over pixels
    cls = jax.lax.broadcasted_iota(jnp.int32, logp.shape, 0)                 # (K, T) class ids
    valid = lbl >= 0                                                         # (1, T) bool
    onehot = (cls == lbl).astype(jnp.float32)                                # (K, T)
    gathered = jnp.sum(logp * onehot, axis=0, keepdims=True)                 # (1, T) logp[label]
    nll = jnp.where(valid, -gathered, 0.0)                                   # (1, T)

    # argmax over classes, first-index tie-break like torch.max (done in f32 for the sublane min)
    mx = jnp.max(logp, axis=0, keepdims=True)
    clsf = cls.astype(jnp.float32)
    amax = jnp.min(jnp.where(logp == mx, clsf, float(num_classes)),
                   axis=0, keepdims=True)                                    # (1, T) f32
    correct = jnp.where(jnp.logical_and(valid, amax == lbl.astype(jnp.float32)), 1.0, 0.0)
    validf = valid.astype(jnp.float32)

    loss_p = jnp.sum(nll, keepdims=True)        # (1, 1)
    acc_p = jnp.sum(correct, keepdims=True)     # (1, 1)
    valid_p = jnp.sum(validf, keepdims=True)    # (1, 1)

    # single lane-dense (8,128) store per tile: partials at column 0 of rows 0..2, zeros elsewhere
    row = jax.lax.broadcasted_iota(jnp.int32, (8, 128), 0)
    col = jax.lax.broadcasted_iota(jnp.int32, (8, 128), 1)
    vals = jnp.where(row == 0, loss_p,
                     jnp.where(row == 1, acc_p,
                               jnp.where(row == 2, valid_p, 0.0)))
    o_ref[...] = jnp.where(col == 0, vals, 0.0)


def segmentation_forward(img_nchw, label, params):
    """Training branch of SegmentationModule.forward: returns (loss, acc)."""
    w1, b1, w2, b2 = params            # w1 (Cin, Cenc), b1 (1, Cenc), w2 (Cenc, K), b2 (1, K)
    n, cin, h, w = img_nchw.shape
    cenc = w1.shape[1]
    k = w2.shape[1]
    hw = h * w
    t_hw = _pick_pixel_tile(hw)
    num_t = hw // t_hw
    g = n * num_t

    # Free reshape of NCHW (no transpose pass): channels stay on sublanes, pixels on lanes.
    x = img_nchw.reshape(n, cin, hw).astype(jnp.float32)
    # torch.squeeze(label) equivalent (robust for N == 1 as well): (N, 1, H, W) -> (N, 1, H*W)
    lbl = label.reshape(n, 1, hw).astype(jnp.int32)

    w1t = jnp.asarray(w1.T, jnp.float32)                 # (Cenc, Cin)
    w2t = jnp.asarray(w2.T, jnp.float32)                 # (K, Cenc)
    b1c = jnp.asarray(b1, jnp.float32).reshape(cenc, 1)  # (Cenc, 1)
    b2c = jnp.asarray(b2, jnp.float32).reshape(k, 1)     # (K, 1)

    partials = pl.pallas_call(
        functools.partial(fused_seg_kernel, num_classes=k),
        out_shape=jax.ShapeDtypeStruct((8, g * 128), jnp.float32),
        grid=(n, num_t),
        in_specs=[
            pl.BlockSpec((1, cin, t_hw), lambda i, j: (i, 0, j)),   # x
            pl.BlockSpec((1, 1, t_hw), lambda i, j: (i, 0, j)),     # label
            pl.BlockSpec((cenc, cin), lambda i, j: (0, 0)),         # w1^T
            pl.BlockSpec((cenc, 1), lambda i, j: (0, 0)),           # b1
            pl.BlockSpec((k, cenc), lambda i, j: (0, 0)),           # w2^T
            pl.BlockSpec((k, 1), lambda i, j: (0, 0)),              # b2
        ],
        out_specs=pl.BlockSpec((8, 128), lambda i, j: (0, i * num_t + j)),
        compiler_params=pltpu.CompilerParams(
            dimension_semantics=("parallel", "parallel")),
    )(x, lbl, w1t, b1c, w2t, b2c)

    sums = jnp.sum(partials, axis=1)            # (8,): rows 0..2 = loss_sum, acc_sum, valid_sum
    loss_sum, acc_sum, valid_sum = sums[0], sums[1], sums[2]
    # NLLLoss(ignore_index=-1, reduction='mean'); valid_sum == 0 yields NaN, matching PyTorch.
    loss = loss_sum / valid_sum
    acc = acc_sum / (valid_sum + 1e-10)         # pixel_acc
    return loss, acc


def make_params(key, cin, cenc, num_classes):
    k1, k2, k3, k4 = jax.random.split(key, 4)
    w1 = jax.random.normal(k1, (cin, cenc), jnp.float32) * 0.2
    b1 = jax.random.normal(k2, (1, cenc), jnp.float32) * 0.05
    w2 = jax.random.normal(k3, (cenc, num_classes), jnp.float32) * 0.2
    b2 = jax.random.normal(k4, (1, num_classes), jnp.float32) * 0.05
    return w1, b1, w2, b2


if __name__ == "__main__":
    key = jax.random.PRNGKey(0)
    kimg, klbl, kpar = jax.random.split(key, 3)

    N, CIN, H, W = 2, 4, 16, 16
    CENC, NUM_CLASSES = 32, 8

    img = jax.random.normal(kimg, (N, CIN, H, W), jnp.float32)        # NCHW like PyTorch
    label = jax.random.randint(klbl, (N, 1, H, W), -1, NUM_CLASSES)    # -1 = ignore_index
    params = make_params(kpar, CIN, CENC, NUM_CLASSES)

    loss, acc = segmentation_forward(img, label, params)
    jax.block_until_ready((loss, acc))

    print("KERNEL_OK")
</pallas_src>

<mosaic_0001>
module attributes {stable_mosaic.version = 11 : i64} {
  func.func @fused_seg_kernel(%arg0: i32, %arg1: i32, %arg2: memref<1x4x256xf32, #tpu.memory_space<vmem>>, %arg3: memref<1x1x256xi32, #tpu.memory_space<vmem>>, %arg4: memref<32x4xf32, #tpu.memory_space<vmem>>, %arg5: memref<32x1xf32, #tpu.memory_space<vmem>>, %arg6: memref<8x32xf32, #tpu.memory_space<vmem>>, %arg7: memref<8x1xf32, #tpu.memory_space<vmem>>, %arg8: memref<8x128xf32, #tpu.memory_space<vmem>>) attributes {dimension_semantics = [#tpu.dimension_semantics<parallel>, #tpu.dimension_semantics<parallel>], iteration_bounds = array<i64: 2, 1>, scalar_prefetch = 0 : i64, scratch_operands = 0 : i64, tpu.core_type = #tpu.core_type<tc>, window_params = [{transform_indices = @transform_0, window_bounds = array<i64: 1, 4, 256>}, {transform_indices = @transform_1, window_bounds = array<i64: 1, 1, 256>}, {pipeline_mode = #tpu.pipeline_mode<synchronous>, transform_indices = @transform_2, window_bounds = array<i64: 32, 4>}, {pipeline_mode = #tpu.pipeline_mode<synchronous>, transform_indices = @transform_3, window_bounds = array<i64: 32, 1>}, {pipeline_mode = #tpu.pipeline_mode<synchronous>, transform_indices = @transform_4, window_bounds = array<i64: 8, 32>}, {pipeline_mode = #tpu.pipeline_mode<synchronous>, transform_indices = @transform_5, window_bounds = array<i64: 8, 1>}, {transform_indices = @transform_6, window_bounds = array<i64: 8, 128>}]} {
    %c0 = arith.constant 0 : index
    %c0_0 = arith.constant 0 : index
    %c0_1 = arith.constant 0 : index
    %0 = vector.load %arg2[%c0, %c0_0, %c0_1] : memref<1x4x256xf32, #tpu.memory_space<vmem>>, vector<1x4x256xf32>
    %1 = vector.shape_cast %0 : vector<1x4x256xf32> to vector<4x256xf32>
    %c0_2 = arith.constant 0 : index
    %c0_3 = arith.constant 0 : index
    %c0_4 = arith.constant 0 : index
    %2 = vector.load %arg3[%c0_2, %c0_3, %c0_4] : memref<1x1x256xi32, #tpu.memory_space<vmem>>, vector<1x1x256xi32>
    %3 = vector.shape_cast %2 : vector<1x1x256xi32> to vector<1x256xi32>
    %c0_5 = arith.constant 0 : index
    %c0_6 = arith.constant 0 : index
    %4 = vector.load %arg4[%c0_5, %c0_6] : memref<32x4xf32, #tpu.memory_space<vmem>>, vector<32x4xf32>
    %cst = arith.constant dense<0.000000e+00> : vector<32x256xf32>
    %5 = tpu.matmul %4, %1, %cst {dimension_numbers = #tpu.dot_dimension_numbers<[1], [0], [0], [1], [0, 0, 1, 1], [], []>} : vector<32x4xf32>, vector<4x256xf32>, vector<32x256xf32> -> vector<32x256xf32>
    %c0_7 = arith.constant 0 : index
    %c0_8 = arith.constant 0 : index
    %6 = vector.load %arg5[%c0_7, %c0_8] : memref<32x1xf32, #tpu.memory_space<vmem>>, vector<32x1xf32>
    %7 = vector.broadcast %6 : vector<32x1xf32> to vector<32x256xf32>
    %8 = arith.addf %5, %7 : vector<32x256xf32>
    %cst_9 = arith.constant 0.000000e+00 : f32
    %9 = vector.broadcast %cst_9 : f32 to vector<32x256xf32>
    %10 = arith.maximumf %8, %9 : vector<32x256xf32>
    %c0_10 = arith.constant 0 : index
    %c0_11 = arith.constant 0 : index
    %11 = vector.load %arg6[%c0_10, %c0_11] : memref<8x32xf32, #tpu.memory_space<vmem>>, vector<8x32xf32>
    %cst_12 = arith.constant dense<0.000000e+00> : vector<8x256xf32>
    %12 = tpu.matmul %11, %10, %cst_12 {dimension_numbers = #tpu.dot_dimension_numbers<[1], [0], [0], [1], [0, 0, 1, 1], [], []>} : vector<8x32xf32>, vector<32x256xf32>, vector<8x256xf32> -> vector<8x256xf32>
    %c0_13 = arith.constant 0 : index
    %c0_14 = arith.constant 0 : index
    %13 = vector.load %arg7[%c0_13, %c0_14] : memref<8x1xf32, #tpu.memory_space<vmem>>, vector<8x1xf32>
    %14 = vector.broadcast %13 : vector<8x1xf32> to vector<8x256xf32>
    %15 = arith.addf %12, %14 : vector<8x256xf32>
    %cst_15 = arith.constant dense<0xFF800000> : vector<256xf32>
    %16 = vector.multi_reduction <maximumf>, %15, %cst_15 [0] : vector<8x256xf32> to vector<256xf32>
    %17 = vector.shape_cast %16 : vector<256xf32> to vector<1x256xf32>
    %18 = vector.broadcast %17 : vector<1x256xf32> to vector<8x256xf32>
    %19 = arith.subf %15, %18 : vector<8x256xf32>
    %20 = math.exp %19 : vector<8x256xf32>
    %cst_16 = arith.constant dense<0.000000e+00> : vector<256xf32>
    %21 = vector.multi_reduction <add>, %20, %cst_16 [0] : vector<8x256xf32> to vector<256xf32>
    %22 = vector.shape_cast %21 : vector<256xf32> to vector<1x256xf32>
    %23 = math.log %22 : vector<1x256xf32>
    %24 = vector.broadcast %23 : vector<1x256xf32> to vector<8x256xf32>
    %25 = arith.subf %19, %24 : vector<8x256xf32>
    %26 = tpu.iota {dimensions = array<i32: 0>} : vector<8x256xi32>
    %c0_i32 = arith.constant 0 : i32
    %27 = vector.broadcast %c0_i32 : i32 to vector<1x256xi32>
    %28 = arith.cmpi sge, %3, %27 : vector<1x256xi32>
    %29 = vector.broadcast %3 : vector<1x256xi32> to vector<8x256xi32>
    %30 = arith.cmpi eq, %26, %29 : vector<8x256xi32>
    %31 = arith.extui %30 : vector<8x256xi1> to vector<8x256xi32>
    %32 = arith.sitofp %31 : vector<8x256xi32> to vector<8x256xf32>
    %33 = arith.mulf %25, %32 : vector<8x256xf32>
    %cst_17 = arith.constant dense<0.000000e+00> : vector<256xf32>
    %34 = vector.multi_reduction <add>, %33, %cst_17 [0] : vector<8x256xf32> to vector<256xf32>
    %35 = vector.shape_cast %34 : vector<256xf32> to vector<1x256xf32>
    %cst_18 = arith.constant 0.000000e+00 : f32
    %36 = vector.broadcast %cst_18 : f32 to vector<1x256xf32>
    %37 = arith.subf %36, %35 : vector<1x256xf32>
    %cst_19 = arith.constant 0.000000e+00 : f32
    %38 = vector.broadcast %cst_19 : f32 to vector<1x256xf32>
    %39 = arith.select %28, %37, %38 : vector<1x256xi1>, vector<1x256xf32>
    %cst_20 = arith.constant dense<0xFF800000> : vector<256xf32>
    %40 = vector.multi_reduction <maximumf>, %25, %cst_20 [0] : vector<8x256xf32> to vector<256xf32>
    %41 = vector.shape_cast %40 : vector<256xf32> to vector<1x256xf32>
    %42 = arith.sitofp %26 : vector<8x256xi32> to vector<8x256xf32>
    %43 = vector.broadcast %41 : vector<1x256xf32> to vector<8x256xf32>
    %44 = arith.cmpf oeq, %25, %43 : vector<8x256xf32>
    %cst_21 = arith.constant 8.000000e+00 : f32
    %45 = vector.broadcast %cst_21 : f32 to vector<8x256xf32>
    %46 = arith.select %44, %42, %45 : vector<8x256xi1>, vector<8x256xf32>
    %cst_22 = arith.constant dense<0x7F800000> : vector<256xf32>
    %47 = vector.multi_reduction <minimumf>, %46, %cst_22 [0] : vector<8x256xf32> to vector<256xf32>
    %48 = vector.shape_cast %47 : vector<256xf32> to vector<1x256xf32>
    %49 = arith.sitofp %3 : vector<1x256xi32> to vector<1x256xf32>
    %50 = arith.cmpf oeq, %48, %49 : vector<1x256xf32>
    %51 = arith.andi %28, %50 : vector<1x256xi1>
    %cst_23 = arith.constant 1.000000e+00 : f32
    %cst_24 = arith.constant 0.000000e+00 : f32
    %52 = vector.broadcast %cst_23 : f32 to vector<1x256xf32>
    %53 = vector.broadcast %cst_24 : f32 to vector<1x256xf32>
    %54 = arith.select %51, %52, %53 : vector<1x256xi1>, vector<1x256xf32>
    %55 = arith.extui %28 : vector<1x256xi1> to vector<1x256xi32>
    %56 = arith.sitofp %55 : vector<1x256xi32> to vector<1x256xf32>
    %57 = vector.shape_cast %39 : vector<1x256xf32> to vector<1x1x256xf32>
    %cst_25 = arith.constant dense<0.000000e+00> : vector<1xf32>
    %58 = vector.multi_reduction <add>, %57, %cst_25 [1, 2] : vector<1x1x256xf32> to vector<1xf32>
    %59 = vector.shape_cast %58 : vector<1xf32> to vector<1x1x1xf32>
    %60 = vector.extract %59[0, 0, 0] : f32 from vector<1x1x1xf32>
    %61 = vector.broadcast %60 : f32 to vector<1x1xf32>
    %62 = vector.shape_cast %54 : vector<1x256xf32> to vector<1x1x256xf32>
    %cst_26 = arith.constant dense<0.000000e+00> : vector<1xf32>
    %63 = vector.multi_reduction <add>, %62, %cst_26 [1, 2] : vector<1x1x256xf32> to vector<1xf32>
    %64 = vector.shape_cast %63 : vector<1xf32> to vector<1x1x1xf32>
    %65 = vector.extract %64[0, 0, 0] : f32 from vector<1x1x1xf32>
    %66 = vector.broadcast %65 : f32 to vector<1x1xf32>
    %67 = vector.shape_cast %56 : vector<1x256xf32> to vector<1x1x256xf32>
    %cst_27 = arith.constant dense<0.000000e+00> : vector<1xf32>
    %68 = vector.multi_reduction <add>, %67, %cst_27 [1, 2] : vector<1x1x256xf32> to vector<1xf32>
    %69 = vector.shape_cast %68 : vector<1xf32> to vector<1x1x1xf32>
    %70 = vector.extract %69[0, 0, 0] : f32 from vector<1x1x1xf32>
    %71 = vector.broadcast %70 : f32 to vector<1x1xf32>
    %72 = tpu.iota {dimensions = array<i32: 0>} : vector<8x128xi32>
    %73 = tpu.iota {dimensions = array<i32: 1>} : vector<8x128xi32>
    %c0_i32_28 = arith.constant 0 : i32
    %74 = vector.broadcast %c0_i32_28 : i32 to vector<8x128xi32>
    %75 = arith.cmpi eq, %72, %74 : vector<8x128xi32>
    %c1_i32 = arith.constant 1 : i32
    %76 = vector.broadcast %c1_i32 : i32 to vector<8x128xi32>
    %77 = arith.cmpi eq, %72, %76 : vector<8x128xi32>
    %c2_i32 = arith.constant 2 : i32
    %78 = vector.broadcast %c2_i32 : i32 to vector<8x128xi32>
    %79 = arith.cmpi eq, %72, %78 : vector<8x128xi32>
    %cst_29 = arith.constant 0.000000e+00 : f32
    %80 = vector.shape_cast %71 : vector<1x1xf32> to vector<1x1xf32>
    %81 = vector.broadcast %80 : vector<1x1xf32> to vector<8x128xf32>
    %82 = vector.broadcast %cst_29 : f32 to vector<8x128xf32>
    %83 = arith.select %79, %81, %82 : vector<8x128xi1>, vector<8x128xf32>
    %84 = vector.shape_cast %66 : vector<1x1xf32> to vector<1x1xf32>
    %85 = vector.broadcast %84 : vector<1x1xf32> to vector<8x128xf32>
    %86 = arith.select %77, %85, %83 : vector<8x128xi1>, vector<8x128xf32>
    %87 = vector.shape_cast %61 : vector<1x1xf32> to vector<1x1xf32>
    %88 = vector.broadcast %87 : vector<1x1xf32> to vector<8x128xf32>
    %89 = arith.select %75, %88, %86 : vector<8x128xi1>, vector<8x128xf32>
    %c0_i32_30 = arith.constant 0 : i32
    %90 = vector.broadcast %c0_i32_30 : i32 to vector<8x128xi32>
    %91 = arith.cmpi eq, %73, %90 : vector<8x128xi32>
    %cst_31 = arith.constant 0.000000e+00 : f32
    %92 = vector.broadcast %cst_31 : f32 to vector<8x128xf32>
    %93 = arith.select %91, %89, %92 : vector<8x128xi1>, vector<8x128xf32>
    %c0_32 = arith.constant 0 : index
    %c0_33 = arith.constant 0 : index
    %94 = vector.load %arg8[%c0_32, %c0_33] : memref<8x128xf32, #tpu.memory_space<vmem>>, vector<8x128xf32>
    tpu.vector_store %arg8[%c0_32, %c0_33], %93 {strides = array<i32>} : memref<8x128xf32, #tpu.memory_space<vmem>>, vector<8x128xf32>,
    return
  }
  func.func @transform_0(%arg0: i32, %arg1: i32) -> (i32, i32, i32) {
    %c0_i32 = arith.constant 0 : i32
    %c0_i32_0 = arith.constant 0 : i32
    return %arg0, %c0_i32, %arg1 : i32, i32, i32
  }
  func.func @transform_1(%arg0: i32, %arg1: i32) -> (i32, i32, i32) {
    %c0_i32 = arith.constant 0 : i32
    %c0_i32_0 = arith.constant 0 : i32
    return %arg0, %c0_i32, %arg1 : i32, i32, i32
  }
  func.func @transform_2(%arg0: i32, %arg1: i32) -> (i32, i32) {
    %c0_i32 = arith.constant 0 : i32
    %c0_i32_0 = arith.constant 0 : i32
    %c0_i32_1 = arith.constant 0 : i32
    return %c0_i32, %c0_i32_0 : i32, i32
  }
  func.func @transform_3(%arg0: i32, %arg1: i32) -> (i32, i32) {
    %c0_i32 = arith.constant 0 : i32
    %c0_i32_0 = arith.constant 0 : i32
    %c0_i32_1 = arith.constant 0 : i32
    return %c0_i32, %c0_i32_0 : i32, i32
  }
  func.func @transform_4(%arg0: i32, %arg1: i32) -> (i32, i32) {
    %c0_i32 = arith.constant 0 : i32
    %c0_i32_0 = arith.constant 0 : i32
    %c0_i32_1 = arith.constant 0 : i32
    return %c0_i32, %c0_i32_0 : i32, i32
  }
  func.func @transform_5(%arg0: i32, %arg1: i32) -> (i32, i32) {
    %c0_i32 = arith.constant 0 : i32
    %c0_i32_0 = arith.constant 0 : i32
    %c0_i32_1 = arith.constant 0 : i32
    return %c0_i32, %c0_i32_0 : i32, i32
  }
  func.func @transform_6(%arg0: i32, %arg1: i32) -> (i32, i32) {
    %c1_i32 = arith.constant 1 : i32
    %0 = arith.muli %arg0, %c1_i32 : i32
    %1 = arith.addi %0, %arg1 : i32
    %c0_i32 = arith.constant 0 : i32
    %c0_i32_0 = arith.constant 0 : i32
    return %c0_i32, %1 : i32, i32
  }
}

</mosaic_0001>

<bundles_post_ra>
// kernel: tpu_custom_call.1
= control target key start
LH: loop header
LB: loop body
LE: loop exit
PB: predicated region body
PF: predicated region fallthrough
CT: control target
= control target key end

     0   :  { %11 = vsyncpa [#allocation3], 0  ;;  %s1317_s0 = inlined_call_operand.vmem [shape: f32[2,4,256], index: 0, kind: input, shape index: {}]   ;;  %s1318_s1 = inlined_call_operand.vmem [shape: s32[2,1,256], index: 1, kind: input, shape index: {}]   ;;  %s1319_s2 = inlined_call_operand.vmem [shape: f32[32,4], index: 2, kind: input, shape index: {}]   ;;  %s1320_s3 = inlined_call_operand.vmem [shape: f32[32,1], index: 3, kind: input, shape index: {}]   ;;  %s1321_s4 = inlined_call_operand.vmem [shape: f32[8,32], index: 4, kind: input, shape index: {}]   ;;  %s1322_s5 = inlined_call_operand.vmem [shape: f32[8,1], index: 5, kind: input, shape index: {}]   ;;  %s1323_s6 = inlined_call_operand.hbm [shape: f32[8,256], index: 6, kind: output, shape index: {}]  }
   0x1   :  { %13 = vsyncpa [#allocation3 + $0x1], 0  ;;  %s1110_s21 = smov 0   ;;  %s1112_s22 = smov 0  }
   0x2   :  { %s1114_s23 = smov 0   ;;  %s1116_s24 = smov 0  }
   0x3   :  { %s1118_s25 = smov 0   ;;  %s1120_s26 = smov 0  }
   0x4 LB: > { %s884_s27 = sadd.s32 4294967295, %s1069_s26   ;;  %s885_s28 = sadd.s32 4294967294, %s1069_s26   ;;  %s1069_s26 = sphi %s1120_s26, %s19_s26   ;;  %s1065_s25 = sphi %s1118_s25, %s1330_s25   ;;  %s1061_s24 = sphi %s1116_s24, %s1329_s24   ;;  %s1057_s23 = sphi %s1114_s23, %s1328_s23   ;;  %s1053_s22 = sphi %s1112_s22, %s1327_s22   ;;  %s1049_s21 = sphi %s1110_s21, %s1326_s21  }
   0x5   : > { %s31_s29 = sadd.s32 1, %s1065_s25  ;;  %s180_s30 = sadd.s32 1, %s1057_s23 }
   0x6   : > { %p33_p0 = scmp.ge.s32.totalorder %s31_s29, 2  ;;  %p190_p1 = scmp.ne.s32.totalorder %s1057_s23, %s1053_s22 }
   0x7   : > { %p191_p2 = scmp.eq.s32.totalorder %s884_s27, 1  ;;  %p196_p3 = scmp.ne.s32.totalorder %s1053_s22, %s1049_s21 }
   0x8   : > { %s1332_s29 = smov (%p33_p0, %s31_s29), 0  ;;  %p197_p5 = scmp.eq.s32.totalorder %s885_s28, 1 }
   0x9   : > { %p1150_p4 = por %p191_p2, %p190_p1  ;;  %s177_s8 = ssub.s32 %s1065_s25, %s1332_s29 }
   0xa   : > { %p888_p6 = scmp.ge.s32.totalorder %s1069_s26, 1  ;;  %p178_p7 = scmp.eq.s32.totalorder %s177_s8, 0 }
   0xb   : > { %p1157_p8 = por %p197_p5, %p196_p3  ;;  %p252_p9 = scmp.lt.s32.totalorder %s1069_s26, 3 }
   0xc   : > { %s1163_s10 = scalar_select %p178_p7, %s1057_s23, %s180_s30  }
   0xd   : > { %p253_p10 = pnand %p888_p6, %p252_p9 }
   0xe   : > { %p295_p11 = scmp.lt.s32.totalorder (!%p253_p10), %s1061_s24, 1  ;;  %v1071_v0 = vmov (!%p253_p10), 0.0   ;;  %v320_v1 = vld [vmem:[%s1320_s3] sm:$0xff] (!%p253_p10)  ;;  %v1072_v2 = vmov (!%p253_p10), 0   ;;  %v322_v3 = vld [vmem:[%s1320_s3 + $0x10] sm:$0xff] (!%p253_p10)  ;;  %v321_v4 = vld [vmem:[%s1320_s3 + $0x8] sm:$0xff] (!%p253_p10) }
   0xf   : > { %256 = sbr.rel (%p253_p10) target bundleno = 804 (0x324), region = 44  ;;  %428 = vmatprep.mubr.f32.mxu0 (!%p253_p10), %v1071_v0  ;;  %536 = vmatprep.mubr.f32.mxu1 (!%p253_p10), %v1071_v0  ;;  %v323_v5 = vld [vmem:[%s1320_s3 + $0x18] sm:$0xff] (!%p253_p10)  ;;  %vm359_vm0 = vcmask (!%p253_p10), 1043456   ;;  %v316_v8 = vld [vmem:[%s1319_s2] sm:$0xff] (!%p253_p10)  ;;  %vm346_vm1 = vcmask (!%p253_p10), 31744   ;;  %v317_v10 = vld [vmem:[%s1319_s2 + $0x8] sm:$0xff] (!%p253_p10) }
  0x10   : > { %980 = vset.pattern.permute.xlu0 (!%p253_p10), %v1072_v2  ;;  %981 = vset.pattern.permute.xlu1 (!%p253_p10), %v1072_v2  ;;  %v462_v9 = vld [vmem:[%s1322_s5] sm:$0xff] (!%p253_p10)  ;;  %v318_v11 = vld [vmem:[%s1319_s2 + $0x10] sm:$0xff] (!%p253_p10)  ;;  %v319_v12 = vld [vmem:[%s1319_s2 + $0x18] sm:$0xff] (!%p253_p10)  ;;  %vm468_vm2 = vcmask (!%p253_p10), 261120   ;;  %vm707_vm8 = vcmask (!%p253_p10), 1040384   ;;  %s904_s18 = sshll.u32 (!%p253_p10), %s1061_s24, 7 }
  0x11   : > { %326 = vperm.xlu0 (!%p253_p10), %980, %v320_v1   ;;  %336 = vperm.xlu1 (!%p253_p10), %981, %v322_v3   ;;  %v461_v45 = vld [vmem:[%s1321_s4] sm:$0xff] (!%p253_p10)  ;;  %s1074_s11 = smov (!%p253_p10), [#allocation2]  }
  0x15   : > { %331 = vperm.xlu0 (!%p253_p10), %980, %v321_v4   ;;  %341 = vperm.xlu1 (!%p253_p10), %981, %v323_v5  }
  0x16   : > { %s1172_s13 = scalar_select %p295_p11, %s1061_s24, 1 }
  0x18   : > { %s907_s16 = sshll.u32 %s1172_s13, 3 }
  0x19   : > { %s302_s30 = scalar_lea.vmem %s1317_s0, %s907_s16  ;;  %465 = vperm.xlu0 %980, %v462_v9  }
  0x1a   : > { %v314_v6 = vld [vmem:[%s302_s30] sm:$0xff]  ;;  %s892_s30 = sshll.u32 %s1172_s13, 1  ;;  %s291_s13 = sand.u32 1, %s1053_s22  }
  0x1b   : > { %v345_v7 = vcombine.high %v314_v6, %v314_v6  ;;  %s311_s12 = scalar_lea.vmem %s1318_s1, %s892_s30  ;;  %s889_s14 = sshll.u32 %s291_s13, 3 }
  0x1c   : > { %s293_s19 = scalar_lea.vmem [#allocation2], %s889_s14  ;;  %s1270_s30 = scalar_lea.hbm %s1323_s6, %s904_s18 }
  0x1d   : > { %893 = vmatprep.subr.msk.mxu0 %vm359_vm0, %v345_v7  ;;  %s795_s20 = sshll.u32 %s293_s19, 4  ;;  %s781_s24 = scalar_lea.sflag [#allocation3], %s291_s13  ;;  %s1272_s20 = int_to_ptr.vmem [resolvable:$true] %s795_s20 }
  0x1e   : > { %894 = vmatpush1.msk.msra.mxu0 %vm359_vm0, %v314_v6  ;;  %s991_s8 = scalar_lea.vmem %s1272_s20, 128 }
  0x1f   : > { %895 = vmatmul.mubr.msk.f32.vlgmr.msra.gmra.mrb[0].mxu0 %vm346_vm1, %v316_v8  ;;  %p992_p12 = scmp.ne.s32.totalorder %s1272_s20, %s991_s8 }
  0x20   : > { %434 = vmatprep.mubr.f32.mxu0 %v1071_v0 }
  0x21   : > { %p993_p13 = pnand %p992_p12, %p1150_p4 }
  0x23   : > { %896 = vmatmul.mubr.msk.f32.gmra.mrb[2].mxu0 %vm346_vm1, %v317_v10  ;;  %p994_p0 = pneg %p993_p13 }
  0x24   : > { %440 = vmatprep.mubr.f32.mxu0 %v1071_v0 }
  0x27   : > { %897 = vmatmul.mubr.msk.f32.gmra.mrb[4].mxu0 %vm346_vm1, %v318_v11 }
  0x28   : > { %446 = vmatprep.mubr.f32.mxu0 %v1071_v0 }
  0x2b   : > { %898 = vmatmul.mubr.msk.f32.gmra.mrb[6].mxu0 %vm346_vm1, %v319_v12  ;;  %v579_v12 = vlaneseq }
  0x90   : > { %v327_v13 = vpop.permute.xlu0 %326  ;;  %v337_v22 = vpop.permute.xlu1 %336 }
  0x94   : > { %v332_v17 = vpop.permute.xlu0 %331  ;;  %v342_v33 = vpop.permute.xlu1 %341 }
  0x98   : > { %v466_v46 = vpop.permute.xlu0 %465 }
  0xf2   : > { %v430_v14 = vpop.f32.mrb[0].mxu0 }
  0xf3   : > { %v432_v15 = vpop.f32.mrb[1].mxu0  ;;  %v431_v16 = vadd.f32 %v430_v14, %v327_v13 }
  0xf4   : > { %v433_v18 = vadd.f32 %v432_v15, %v327_v13 }
  0xf5   : > { %v453_v24 = vmax.f32 %v431_v16, 0.0 }
  0xf6   : > { %v436_v19 = vpop.f32.mrb[2].mxu0  ;;  %v454_v26 = vmax.f32 %v433_v18, 0.0 }
  0xf7   : > { %v437_v20 = vadd.f32 %v436_v19, %v332_v17  ;;  %v438_v21 = vpop.f32.mrb[3].mxu0 }
  0xf8   : > { %v439_v23 = vadd.f32 %v438_v21, %v332_v17  ;;  %v1212_v17 = vshrl.u32 %v579_v12, 7 }
  0xf9   : > { %v455_v25 = vmax.f32 %v437_v20, 0.0 }
  0xfa   : > { %v456_v27 = vmax.f32 %v439_v23, 0.0  ;;  %v442_v28 = vpop.f32.mrb[4].mxu0  ;;  %v1218_v21 = vsub.s32 0, %v1212_v17  ;;  %v1223_v23 = vsub.s32 1, %v1212_v17  ;;  %vm770_vm13 = vcmp.eq.s32.totalorder %v1212_v17, 2 }
  0xfb   : > { %v444_v29 = vpop.f32.mrb[5].mxu0  ;;  %v910_v30 = vpack.c.bf16 %v455_v25, %v453_v24  ;;  %v443_v32 = vadd.f32 %v442_v28, %v337_v22  ;;  %vm769_vm14 = vcmp.eq.s32.totalorder %v1212_v17, 1  ;;  %vm768_vm15 = vcmp.eq.s32.totalorder %v1212_v17, 0 }
  0xfc   : > { %v908_v31 = vpack.c.bf16 %v456_v27, %v454_v26  ;;  %v445_v34 = vadd.f32 %v444_v29, %v337_v22  ;;  %v1220_v22 = vld [vmem:[%s311_s12] sm:$0x3]  ;;  %s995_s12 = sshll.u32 %s1074_s11, 4  ;;  %s996_s12 = int_to_ptr.vmem [resolvable:$false] %s995_s12 }
  0xfd   : > { %v457_v39 = vmax.f32 %v443_v32, 0.0  ;;  %v585_v24 = vrot.slane %v1220_v22, %v1218_v21  ;;  %v589_v25 = vrot.slane %v1220_v22, %v1223_v23  ;;  %vm581_vm7 = vcmp.ge.s32.totalorder %v1220_v22, 0  ;;  %s997_s14 = scalar_lea.vmem %s996_s12, 256  ;;  %p998_p1 = scmp.lt.s32.totalorder %s1272_s20, %s996_s12 }
  0xfe   : > { %v448_v35 = vpop.f32.mrb[6].mxu0  ;;  %909 = vmatprep.subr.bf16.mxu1 %v908_v31  ;;  %v458_v41 = vmax.f32 %v445_v34, 0.0  ;;  %p999_p2 = scmp.lt.s32.totalorder %s997_s14, %s991_s8 }
  0xff   : > { %v449_v36 = vadd.f32 %v448_v35, %v342_v33  ;;  %v450_v37 = vpop.f32.mrb[7].mxu0  ;;  %911 = vmatpush1.bf16.msra.mxu1 %v910_v30  ;;  %vm590_vm3 = vcmp.eq.s32.totalorder %v1212_v17, %v585_v24  ;;  %vm591_vm4 = vcmp.eq.s32.totalorder %v1212_v17, %v589_v25 }
 0x100   : > { %v451_v38 = vadd.f32 %v450_v37, %v342_v33  ;;  %v900_v29 = vsel %vm590_vm3, 1.0, %v1071_v0  ;;  %v901_v31 = vsel %vm591_vm4, 1.0, %v1071_v0  ;;  %p1000_p3 = por %p999_p2, %p998_p1 }
 0x101   : > { %v459_v40 = vmax.f32 %v449_v36, 0.0 }
 0x102   : > { %v460_v42 = vmax.f32 %v451_v38, 0.0  ;;  %p1001_p5 = pnand %p1000_p3, %p994_p0 }
 0x103   : > { %v914_v43 = vpack.c.bf16 %v459_v40, %v457_v39 }
 0x104   : > { %v912_v44 = vpack.c.bf16 %v460_v42, %v458_v41 }
 0x106   : > { %913 = vmatprep.subr.bf16.mxu1 %v912_v44 }
 0x107   : > { %915 = vmatpush1.bf16.msra.mxu1 %v914_v43 }
 0x10a   : > { %899 = vmatmul.mubr.msk.f32.vlgmr.msra.gmra.mrb[0].mxu1 %vm468_vm2, %v461_v45 }
 0x1dd   : > { %v538_v47 = vpop.f32.mrb[0].mxu1 }
 0x1de   : > { %v539_v48 = vadd.f32 %v538_v47, %v466_v46  ;;  %v540_v49 = vpop.f32.mrb[1].mxu1 }
 0x1df   : > { %v541_v50 = vadd.f32 %v540_v49, %v466_v46 }
 0x1e0   : > { %v543_v51 = vrot.slane %v539_v48, 4 }
 0x1e1   : > { %v549_v52 = vrot.slane %v541_v50, 4 }
 0x1e2   : > { %v544_v53 = vmax.f32 %v539_v48, %v543_v51 }
 0x1e3   : > { %v550_v54 = vmax.f32 %v541_v50, %v549_v52 }
 0x1e4   : > { %v545_v55 = vrot.slane %v544_v53, 2 }
 0x1e5   : > { %v551_v56 = vrot.slane %v550_v54, 2 }
 0x1e6   : > { %v546_v57 = vmax.f32 %v544_v53, %v545_v55 }
 0x1e7   : > { %v552_v58 = vmax.f32 %v550_v54, %v551_v56  ;;  %v643_v54 = vcvt.s32.f32 %v1212_v17 }
 0x1e8   : > { %v547_v59 = vrot.slane %v546_v57, 1 }
 0x1e9   : > { %v553_v60 = vrot.slane %v552_v58, 1 }
 0x1ea   : > { %v548_v61 = vmax.f32 %v546_v57, %v547_v59 }
 0x1eb   : > { %v554_v62 = vmax.f32 %v552_v58, %v553_v60 }
 0x1ec   : > { %v555_v63 = vsub.f32 %v539_v48, %v548_v61 }
 0x1ed   : > { %v556_v1 = vsub.f32 %v541_v50, %v554_v62  ;;  %v1073_v50 = vmov 1966171168  }
 0x1ee   : > { %v557_v3 = vmul.f32 1.442695, %v555_v63  ;;  %v616_v51 = vunpack.c.l.s4 %v1073_v50 }
 0x1ef   : > { %v559_v4 = vmul.f32 1.442695, %v556_v1 }
 0x1f0   : > { %983 = vpow2.f32 %v557_v3  ;;  %v617_v61 = vunpack.c.0.s8 %v616_v51 }
 0x1f1   : > { %985 = vpow2.f32 %v559_v4 }
 0x1fa   : > { %v984_v5 = vpop.eup %983 }
 0x1fb   : > { %v986_v6 = vpop.eup %985  ;;  %v561_v7 = vrot.slane %v984_v5, 4 }
 0x1fc   : > { %v567_v8 = vrot.slane %v986_v6, 4 }
 0x1fd   : > { %v562_v9 = vadd.f32 %v984_v5, %v561_v7 }
 0x1fe   : > { %v568_v10 = vadd.f32 %v986_v6, %v567_v8  ;;  %v620_v8 = vsub.s32 %v617_v61, %v1212_v17 }
 0x1ff   : > { %v563_v11 = vrot.slane %v562_v9, 2 }
 0x200   : > { %v569_v13 = vrot.slane %v568_v10, 2 }
 0x201   : > { %v564_v14 = vadd.f32 %v563_v11, %v562_v9 }
 0x202   : > { %v570_v15 = vadd.f32 %v569_v13, %v568_v10  ;;  %v660_v13 = vcvt.s32.f32 %v1220_v22 }
 0x203   : > { %v565_v16 = vrot.slane %v564_v14, 1 }
 0x204   : > { %v571_v18 = vrot.slane %v570_v15, 1  ;;  %v665_v24 = vrot.slane %v660_v13, %v1218_v21 }
 0x205   : > { %v566_v19 = vadd.f32 %v565_v16, %v564_v14 }
 0x206   : > { %v572_v20 = vadd.f32 %v571_v18, %v570_v15 }
 0x207   : > { %987 = vlog2.f32 %v566_v19 }
 0x208   : > { %989 = vlog2.f32 %v572_v20 }
 0x211   : > { %v988_v26 = vpop.eup %987 }
 0x212   : > { %v990_v27 = vpop.eup %989  ;;  %v574_v28 = vmul.f32 0.6931472, %v988_v26  ;;  %v669_v26 = vrot.slane %v660_v13, %v1223_v23 }
 0x213   : > { %v576_v30 = vmul.f32 0.6931472, %v990_v27 }
 0x214   : > { %v577_v32 = vsub.f32 %v555_v63, %v574_v28 }
 0x215   : > { %v578_v33 = vsub.f32 %v556_v1, %v576_v30 }
 0x216   : > { %v596_v34 = vmul.f32 %v900_v29, %v577_v32  ;;  %v631_v35 = vrot.slane %v577_v32, 4 }
 0x217   : > { %v597_v36 = vmul.f32 %v901_v31, %v578_v33  ;;  %v637_v37 = vrot.slane %v578_v33, 4 }
 0x218   : > { %v598_v38 = vrot.slane %v596_v34, 4  ;;  %v632_v39 = vmax.f32 %v577_v32, %v631_v35 }
 0x219   : > { %v604_v40 = vrot.slane %v597_v36, 4  ;;  %v638_v41 = vmax.f32 %v578_v33, %v637_v37 }
 0x21a   : > { %v599_v42 = vadd.f32 %v598_v38, %v596_v34  ;;  %v633_v43 = vrot.slane %v632_v39, 2 }
 0x21b   : > { %v605_v44 = vadd.f32 %v604_v40, %v597_v36  ;;  %v639_v45 = vrot.slane %v638_v41, 2 }
 0x21c   : > { %v634_v46 = vmax.f32 %v632_v39, %v633_v43  ;;  %v600_v47 = vrot.slane %v599_v42, 2 }
 0x21d   : > { %v640_v48 = vmax.f32 %v638_v41, %v639_v45  ;;  %v606_v49 = vrot.slane %v605_v44, 2  ;;  %v902_v41 = vsel %vm581_vm7, 1.0, %v1071_v0 }
 0x21e   : > { %v635_v52 = vrot.slane %v634_v46, 1  ;;  %v601_v53 = vadd.f32 %v600_v47, %v599_v42  ;;  %v747_v42 = vrot.slane %v902_v41, %v1218_v21  ;;  %v751_v43 = vrot.slane %v902_v41, %v1223_v23 }
 0x21f   : > { %v641_v55 = vrot.slane %v640_v48, 1  ;;  %v607_v56 = vadd.f32 %v606_v49, %v605_v44 }
 0x220   : > { %v636_v57 = vmax.f32 %v634_v46, %v635_v52  ;;  %v602_v58 = vrot.slane %v601_v53, 1  ;;  %v755_v49 = vsel %vm707_vm8, %v751_v43, 0.0 }
 0x221   : > { %v642_v59 = vmax.f32 %v640_v48, %v641_v55  ;;  %v608_v60 = vrot.slane %v607_v56, 1  ;;  %v754_v48 = vsel %vm707_vm8, %v747_v42, 0.0 }
 0x222   : > { %vm644_vm5 = vcmp.eq.f32.partialorder %v577_v32, %v636_v57  ;;  %v603_v62 = vadd.f32 %v602_v58, %v601_v53  ;;  %v756_v50 = vadd.f32 %v755_v49, %v754_v48 }
 0x223   : > { %v646_v63 = vsel %vm644_vm5, %v643_v54, 8.0  ;;  %vm645_vm6 = vcmp.eq.f32.partialorder %v578_v33, %v642_v59  ;;  %v609_v1 = vadd.f32 %v608_v60, %v607_v56 }
 0x224   : > { %v648_v3 = vrot.slane %v646_v63, 4  ;;  %v647_v4 = vsel %vm645_vm6, %v643_v54, 8.0  ;;  %v610_v5 = vsub.f32 0.0, %v603_v62 }
 0x225   : > { %v654_v6 = vrot.slane %v647_v4, 4  ;;  %v611_v7 = vsub.f32 0.0, %v609_v1 }
 0x226   : > { %v649_v9 = vmin.f32 %v646_v63, %v648_v3 }
 0x227   : > { %v655_v10 = vmin.f32 %v647_v4, %v654_v6  ;;  %v614_v11 = vcombine.low %v610_v5, %v611_v7  ;;  %v767_v7 = vand.u32 127, %v579_v12 }
 0x228   : > { %v650_v14 = vrot.slane %v649_v9, 2 }
 0x229   : > { %v656_v15 = vrot.slane %v655_v10, 2  ;;  %v621_v16 = vrot.slane %v614_v11, %v620_v8  ;;  %vm777_vm0 = vcmp.eq.s32.totalorder %v767_v7, 0 }
 0x22a   : > { %v651_v18 = vmin.f32 %v649_v9, %v650_v14 }
 0x22b   : > { %v628_v19 = vrot.slane %v621_v16, %v620_v8  ;;  %v657_v20 = vmin.f32 %v655_v10, %v656_v15 }
 0x22c   : > { %v652_v25 = vrot.slane %v651_v18, 1 }
 0x22d   : > { %v630_v27 = vsel %vm581_vm7, %v628_v19, 0.0  ;;  %v658_v28 = vrot.slane %v657_v20, 1 }
 0x22e   : > { %v700_v29 = vrot.slane %v630_v27, %v1218_v21  ;;  %v704_v30 = vrot.slane %v630_v27, %v1223_v23  ;;  %v653_v31 = vmin.f32 %v651_v18, %v652_v25 }
 0x22f   : > { %v659_v32 = vmin.f32 %v657_v20, %v658_v28 }
 0x230   : > { %v708_v33 = vsel %vm707_vm8, %v700_v29, 0.0  ;;  %v709_v34 = vsel %vm707_vm8, %v704_v30, 0.0  ;;  %vm672_vm9 = vcmp.eq.f32.partialorder %v653_v31, %v665_v24 }
 0x231   : > { %v710_v35 = vadd.f32 %v709_v34, %v708_v33  ;;  %vm673_vm10 = vcmp.eq.f32.partialorder %v659_v32, %v669_v26  ;;  %v674_v36 = vsel %vm672_vm9, 1, %v1072_v2 }
 0x232   : > { %v675_v37 = vsel %vm673_vm10, 1, %v1072_v2 }
 0x233   : > { %711 = vadd.xlane.f32.xlu1 %v710_v35  ;;  %v676_v38 = vcombine.low %v674_v36, %v675_v37 }
 0x235   : > { %v683_v39 = vrot.slane %v676_v38, %v620_v8 }
 0x237   : > { %v690_v40 = vrot.slane %v683_v39, %v620_v8 }
 0x239   : > { %vm691_vm11 = vcmp.ne.s32.totalorder %v690_v40, 0 }
 0x23a   : > { %vm692_vm12 = vmand %vm581_vm7, %vm691_vm11 }
 0x23b   : > { %v693_v44 = vsel %vm692_vm12, 1.0, %v1071_v0 }
 0x23c   : > { %v724_v2 = vrot.slane %v693_v44, %v1218_v21  ;;  %v728_v45 = vrot.slane %v693_v44, %v1223_v23 }
 0x23e   : > { %v731_v46 = vsel %vm707_vm8, %v724_v2, 0.0  ;;  %v732_v47 = vsel %vm707_vm8, %v728_v45, 0.0 }
 0x23f   : > { %v733_v22 = vadd.f32 %v732_v47, %v731_v46 }
 0x241   : > { %734 = vadd.xlane.f32.xlu0 %v733_v22 }
 0x245   : > { %757 = vadd.xlane.f32.xlu0 %v756_v50 }
 0x2c0   : > { %v712_v51 = vpop.xlane.xlu1 %711 }
 0x2c1   : > { %v713_v52 = vrot.slane %v712_v51, 4 }
 0x2c3   : > { %v714_v53 = vadd.f32 %v713_v52, %v712_v51 }
 0x2c5   : > { %v715_v0 = vrot.slane %v714_v53, 2 }
 0x2c7   : > { %v716_v54 = vadd.f32 %v715_v0, %v714_v53 }
 0x2c9   : > { %v717_v21 = vrot.slane %v716_v54, 1 }
 0x2cb   : > { %v718_v55 = vadd.f32 %v717_v21, %v716_v54 }
 0x2cd   : > { %916 = vpush %v718_v55 }
 0x2ce   : > { %v735_v23 = vpop.xlane.xlu0 %734 }
 0x2cf   : > { %v736_v56 = vrot.slane %v735_v23, 4 }
 0x2d1   : > { %v737_v57 = vadd.f32 %v736_v56, %v735_v23 }
 0x2d2   : > { %v758_v58 = vpop.xlane.xlu0 %757 }
 0x2d3   : > { %v738_v59 = vrot.slane %v737_v57, 2  ;;  %v759_v60 = vrot.slane %v758_v58, 4 }
 0x2d5   : > { %v760_v61 = vadd.f32 %v759_v60, %v758_v58  ;;  %v739_v62 = vadd.f32 %v738_v59, %v737_v57 }
 0x2d7   : > { %v761_v63 = vrot.slane %v760_v61, 2  ;;  %v740_v1 = vrot.slane %v739_v62, 1 }
 0x2d9   : > { %v762_v3 = vadd.f32 %v761_v63, %v760_v61  ;;  %v741_v4 = vadd.f32 %v740_v1, %v739_v62 }
 0x2db   : > { %918 = vpush %v741_v4  ;;  %v763_v5 = vrot.slane %v762_v3, 1 }
 0x2dd   : > { %v764_v6 = vadd.f32 %v763_v5, %v762_v3 }
 0x2df   : > { %920 = vpush %v764_v6 }
 0x2fe   : > { %s917_s15 = spop %916 }
 0x2ff   : > { %v775_v11 = vstv %s917_s15 }
 0x30c   : > { %s919_s16 = spop %918 }
 0x30d   : > { %v773_v9 = vstv %s919_s16 }
 0x310   : > { %s921_s17 = spop %920 }
 0x311   : > { %v771_v8 = vstv %s921_s17 }
 0x312   : > { %v772_v10 = vsel %vm770_vm13, %v771_v8, 0.0 }
 0x313   : > { %v774_v13 = vsel %vm769_vm14, %v773_v9, %v772_v10 }
 0x314   : > { %v776_v14 = vsel %vm768_vm15, %v775_v11, %v774_v13 }
 0x315   : > { %v778_v12 = vsel %vm777_vm0, %v776_v14, 0.0 }
 0x316   : > { %779 = vst [vmem:[%s293_s19] sm:$0xff] %v778_v12 }
 0x317   : > { %1004 = shalt.err (!%p1001_p5)
}
 0x318   : > { %s1005_s13 = scalar_lea.hbm %s1270_s30, 128  ;;  %s1009_s17 = scalar_lea.hbm %s1323_s6, 256 }
 0x319   : > { %p1006_p6 = scmp.ne.s32.totalorder %s1270_s30, %s1005_s13  ;;  %p1010_p10 = scmp.lt.u32.totalorder %s1270_s30, %s1323_s6 }
 0x31a   : > { %p1011_p11 = scmp.lt.u32.totalorder %s1009_s17, %s1005_s13  ;;  %p1013_p13 = scmp.lt.u32.totalorder %s1005_s13, %s1270_s30 }
 0x31b   : > { %p1007_p7 = pnand %p1006_p6, %p1150_p4 }
 0x31c   : > { %p1012_p12 = por %p1011_p11, %p1010_p10 }
 0x31d   : > { %p1008_p9 = pneg %p1007_p7 }
 0x31e   : > { %p1014_p0 = por %p1013_p13, %p1012_p12 }
 0x320   : > { %p1015_p1 = pnand %p1014_p0, %p1008_p9 }
 0x322   : > { %1018 = shalt.err (!%p1015_p1)
}
 0x323   : > { %922 = dma.vmem_to_hbm [thread:$0]  (%p1150_p4), %s1272_s20, 128, %s1270_s30, %s781_s24  }
 0x324 PF: > { %p928_p2 = scmp.ge.s32.totalorder %s1069_s26, 2  ;;  %s807_s27 = sand.u32 1, %s1049_s21  }
 0x325   : > { %s808_s28 = scalar_lea.sflag [#allocation3], %s807_s27 }
 0x326   : > { %p925_p3 = pnand %p928_p2, %p1157_p8 }
 0x328   : > { %1044 = dma.done.wait (!%p925_p3), %s808_s28, 128  }
 0x329   : > { %1046 = vsyncadd (!%p925_p3), %s808_s28, 4294967168  ;;  %s19_s26 = sadd.s32 1, %s1069_s26   ;;  %s1326_s21 = smov %s1053_s22 }
 0x32a   : > { %p16_p5 = scmp.ge.s32.totalorder %s19_s26, 4   ;;  %s1327_s22 = smov %s1057_s23 }
 0x32b   : > { %s1328_s23 = smov %s1163_s10  ;;  %s1329_s24 = smov %s1065_s25 }
 0x32c   : > { %s1330_s25 = smov %s1332_s29  ;;  %18 = sbr.rel (!%p16_p5) target bundleno = 4 (0x4), region = 82 }
 0x333   :  { %813 = vsyncpa [#allocation3], 1 }
 0x334   :  { %815 = vsyncpa [#allocation3 + $0x1], 1 }

</bundles_post_ra>
